<compile_context>
chip_gen: v7x
topology: tpu7x:2x2x1
jax: 0.10.0
libtpu: 0.0.40
codegen_flags: <defaults>
</compile_context>

<pallas_src>
import functools

import jax
import jax.numpy as jnp
import numpy as np
from jax.experimental import pallas as pl
from jax.experimental.pallas import tpu as pltpu

_HALO = 3  # cumulative halo of three chained 3x3 convs


# ---------------------------------------------------------------------------
# Kernels
# ---------------------------------------------------------------------------
def _avg_pool_kernel(p2_ref, out_ref, acc_ref, *, inv_count):
    """AdaptiveAvgPool2d(1): row-tiled sum reduction, mean written at the end."""
    @pl.when(pl.program_id(1) == 0)
    def _():
        acc_ref[...] = jnp.zeros_like(acc_ref)

    blk = p2_ref[0].astype(jnp.float32)                    # (rb, W2, C)
    rb, w2, c = blk.shape
    acc_ref[...] += jnp.sum(blk.reshape(rb * w2, c), axis=0, keepdims=True)

    @pl.when(pl.program_id(1) == pl.num_programs(1) - 1)
    def _():
        out_ref[0] = acc_ref[...] * inv_count


def _fusion_kernel(const1_ref, p1c_ref, p1u_ref, p1d_ref, p2_ref,
                   w1b_ref, w23_ref, b23_ref, w45_ref, b45_ref,
                   w6_ref, b6_ref, f1_ref, f2_ref, *, img_h):
    """FRM convs + 2x2 maxpool + P2 add on one (batch, row-stripe) tile."""
    _, sh, w, c = p1c_ref.shape          # stripe rows, width, channels
    s = pl.program_id(1)
    g0 = s * sh - _HALO                  # global image row of window row 0

    hw = sh + 2 * _HALO                  # window rows (stripe + halo)
    n = hw * w

    # Window: 3 halo rows above (last 3 of the 4-row halo block), the stripe,
    # 3 halo rows below.  Out-of-image halo rows carry garbage from the
    # clamped neighbour blocks and are zeroed by the per-stage row masks.
    win = jnp.concatenate(
        [p1u_ref[0, 1:4], p1c_ref[0], p1d_ref[0, 0:3]], axis=0)   # (hw, W, C)
    x32 = win.reshape(n, c)
    xb = x32.astype(jnp.bfloat16)

    # Hoisted index / mask vectors (reused by all three 3x3 convs).
    p = jax.lax.broadcasted_iota(jnp.int32, (n, 1), 0)
    row = p // w
    col = p - row * w
    gh = row + g0
    row_ok = (gh >= 0) & (gh < img_h)    # in-image row mask (conv2 input rows)
    col_l = col != 0                     # dx=0 taps need column-1 inside image
    col_r = col != (w - 1)               # dx=2 taps need column+1 inside image

    # conv1 (1x1, 2C->C): the nearest-upsampled avg half is spatially constant
    # and is pre-folded on the host into const1 = avg @ W1[:C] + b1.
    y = jnp.dot(xb, w1b_ref[...], preferred_element_type=jnp.float32)
    y = y + const1_ref[0]

    def conv3x3(y_in, rows_in, w_ref, b_ref, row_mask):
        """'same' 3x3 conv; only the rows_in-2 interior rows are computed.

        dy taps are row-offset slices of the (rows_in*W, Cin) buffer; dx taps
        use two column-masked sublane rolls (wrap entries fall on masked
        border columns).  row_mask zeroes out-of-image rows once so they act
        as the conv's zero padding.
        """
        nin = rows_in * w
        nout = nin - 2 * w
        y0 = jnp.where(row_mask[:nin], y_in, 0.0)
        yl = jnp.where(col_l[:nin], pltpu.roll(y0, 1, 0), 0.0)        # x[p-1]
        yr = jnp.where(col_r[:nin], pltpu.roll(y0, nin - 1, 0), 0.0)  # x[p+1]
        xs = (yl.astype(jnp.bfloat16),
              y0.astype(jnp.bfloat16),
              yr.astype(jnp.bfloat16))
        cout = w_ref.shape[-1]
        acc = jnp.zeros((nout, cout), jnp.float32)
        for dy in range(3):
            lo = dy * w
            for dx in range(3):
                acc = acc + jnp.dot(xs[dx][lo:lo + nout], w_ref[dy, dx],
                                    preferred_element_type=jnp.float32)
        return acc + b_ref[...]

    # conv2+conv3 folded (3x3, C->C/4), conv4+conv5 folded (3x3, C/4->C),
    # conv6 (3x3, C->C).  Valid row range shrinks by 2 per conv.
    y = conv3x3(y, hw, w23_ref, b23_ref, row_ok)             # rows: hw-2
    y = conv3x3(y, hw - 2, w45_ref, b45_ref, row_ok[w:])     # rows: hw-4
    y = conv3x3(y, hw - 4, w6_ref, b6_ref, row_ok[2 * w:])   # rows: sh

    f1 = y.reshape(sh, w, c)
    f1_ref[0] = f1.astype(f1_ref.dtype)

    # MaxPool2d(2, 2) of the stripe, then + P2 stripe -> F2
    t = jnp.max(f1.reshape(sh // 2, 2, w, c), axis=1)
    t = jnp.max(t.reshape(sh // 2, w // 2, 2, c), axis=2)
    f2_ref[0] = (t + p2_ref[0].astype(jnp.float32)).astype(f2_ref.dtype)


# ---------------------------------------------------------------------------
# Host-side weight preparation (exact folds, bf16 MXU operands)
# ---------------------------------------------------------------------------
def _prepare_weights(params):
    w1, b1, w2, b2, w3, b3, w4, b4, w5, b5, w6, b6 = params
    c = w1.shape[1]
    hi = jax.lax.Precision.HIGHEST
    w1a = w1[:c]                                  # acts on the upsampled-avg half
    w1b = w1[c:].astype(jnp.bfloat16)             # acts on the P1 half
    # conv2 (3x3, C->C) then conv3 (1x1, C->C/4)  ==  3x3, C -> C/4
    w23 = jnp.einsum("yxio,oq->yxiq", w2, w3, precision=hi).astype(jnp.bfloat16)
    b23 = (jnp.dot(b2, w3, precision=hi) + b3).astype(jnp.float32)
    # conv4 (3x3, C/4->C/4) then conv5 (1x1, C/4->C)  ==  3x3, C/4 -> C
    w45 = jnp.einsum("yxio,oq->yxiq", w4, w5, precision=hi).astype(jnp.bfloat16)
    b45 = (jnp.dot(b4, w5, precision=hi) + b5).astype(jnp.float32)
    kernel_weights = (w1b, w23, b23, w45, b45,
                      w6.astype(jnp.bfloat16), b6.astype(jnp.float32))
    return w1a, b1.astype(jnp.float32), kernel_weights


def _default_vmem_limit():
    """3/4 of physical VMEM (96 MiB on 128-MiB parts, ~48 MiB on v7x)."""
    try:
        cap = int(pltpu.get_tpu_info().vmem_capacity_bytes)
    except Exception:
        cap = 64 << 20
    return min(cap * 3 // 4, 96 << 20)


def _weight_spec(arr, pipeline_mode):
    nd = arr.ndim
    idx = lambda b, s, _n=nd: (0,) * _n
    if pipeline_mode is None:
        return pl.BlockSpec(arr.shape, idx)
    return pl.BlockSpec(arr.shape, idx, pipeline_mode=pipeline_mode)


# ---------------------------------------------------------------------------
# Wrapper
# ---------------------------------------------------------------------------
def feature_fusion(P1, P2, params, *, stripe_rows=None, vmem_limit_bytes=None,
                   single_buffer_weights=True):
    """P1: (B, H, W, C) NHWC; P2: (B, H/2, W/2, C) NHWC.

    `stripe_rows` is the primary tuning knob (larger stripes amortize the
    3-row halo and per-step overhead); default picks the largest multiple of
    8 dividing H, capped at 32.  At the module's real C=256, size it against
    the explicit per-generation `vmem_limit_bytes`.
    """
    B, H, W, C = P1.shape
    _, H2, W2, _ = P2.shape
    assert H == 2 * H2 and W == 2 * W2, "P2 must be the 2x2-pooled size of P1"
    assert H % 8 == 0 and W % 8 == 0, "spatial dims must be multiples of 8"
    if stripe_rows is None:
        stripe_rows = max(r for r in range(8, min(H, 32) + 1, 8) if H % r == 0)
    SH = stripe_rows
    assert SH % 8 == 0 and H % SH == 0
    S = H // SH
    if vmem_limit_bytes is None:
        vmem_limit_bytes = _default_vmem_limit()

    w1a, b1, kweights = _prepare_weights(params)

    # ---- kernel 1: AdaptiveAvgPool2d(1) on P2, row-tiled reduction ---------
    rb = 8 if H2 % 8 == 0 else 4
    avg = pl.pallas_call(
        functools.partial(_avg_pool_kernel, inv_count=1.0 / float(H2 * W2)),
        out_shape=jax.ShapeDtypeStruct((B, 1, C), jnp.float32),
        grid_spec=pltpu.PrefetchScalarGridSpec(
            num_scalar_prefetch=0,
            grid=(B, H2 // rb),
            in_specs=[pl.BlockSpec((1, rb, W2, C), lambda b, r: (b, r, 0, 0))],
            out_specs=pl.BlockSpec((1, 1, C), lambda b, r: (b, 0, 0)),
            scratch_shapes=[pltpu.VMEM((1, C), jnp.float32)]),
        compiler_params=pltpu.CompilerParams(
            dimension_semantics=("parallel", "arbitrary"),
            vmem_limit_bytes=vmem_limit_bytes),
    )(P2)

    # Fold the upsampled-avg half of conv1 into a per-batch bias row (exact:
    # the upsample is a spatial broadcast).  Tiny (B,C)x(C,C) matmul in XLA.
    hi = jax.lax.Precision.HIGHEST
    const1 = (jnp.einsum("bic,cd->bid", avg, w1a, precision=hi)
              + b1.reshape(1, 1, -1)).astype(jnp.float32)

    # ---- kernel 2: FRM + maxpool, tiled over (batch, row stripe) -----------
    hb4 = SH // 4                # stripe height measured in 4-row halo blocks
    nb4 = H // 4                 # total number of 4-row blocks along H
    out_shape = (
        jax.ShapeDtypeStruct((B, H, W, C), P1.dtype),
        jax.ShapeDtypeStruct((B, H2, W2, C), P1.dtype),
    )
    kernel = functools.partial(_fusion_kernel, img_h=H)

    def build(weight_mode):
        in_specs = [
            pl.BlockSpec((1, 1, C), lambda b, s: (b, 0, 0)),             # const1
            pl.BlockSpec((1, SH, W, C), lambda b, s: (b, s, 0, 0)),      # P1 stripe
            pl.BlockSpec((1, 4, W, C),                                   # halo above
                         lambda b, s: (b, jnp.maximum(s * hb4 - 1, 0), 0, 0)),
            pl.BlockSpec((1, 4, W, C),                                   # halo below
                         lambda b, s: (b, jnp.minimum(s * hb4 + hb4, nb4 - 1), 0, 0)),
            pl.BlockSpec((1, SH // 2, W2, C), lambda b, s: (b, s, 0, 0)),  # P2 stripe
        ] + [_weight_spec(wt, weight_mode) for wt in kweights]
        out_specs = (
            pl.BlockSpec((1, SH, W, C), lambda b, s: (b, s, 0, 0)),        # F1
            pl.BlockSpec((1, SH // 2, W2, C), lambda b, s: (b, s, 0, 0)),  # F2
        )
        return pl.pallas_call(
            kernel,
            out_shape=out_shape,
            grid_spec=pltpu.PrefetchScalarGridSpec(
                num_scalar_prefetch=0,
                grid=(B, S),
                in_specs=in_specs,
                out_specs=out_specs),
            compiler_params=pltpu.CompilerParams(
                dimension_semantics=("parallel", "parallel"),
                vmem_limit_bytes=vmem_limit_bytes))

    args = (const1, P1, P1, P1, P2) + kweights
    if single_buffer_weights and hasattr(pl, "Buffered"):
        try:
            # Grid-invariant weights don't need double buffering.
            return build(pl.Buffered(1))(*args)
        except Exception:
            pass  # pipeline_mode not supported here -> default buffering
    return build(None)(*args)


# ---------------------------------------------------------------------------
# Pure-JAX reference (for correctness check; consumes the RAW params)
# ---------------------------------------------------------------------------
def reference_forward(P1, P2, params):
    w1, b1, w2, b2, w3, b3, w4, b4, w5, b5, w6, b6 = params
    B, H, W, C = P1.shape

    def conv1x1(x, w, b):
        y = jnp.einsum("bhwi,io->bhwo", x, w,
                       precision=jax.lax.Precision.HIGHEST)
        return y + b.reshape(1, 1, 1, -1)

    def conv3x3(x, w, b):
        y = jax.lax.conv_general_dilated(
            x, w, window_strides=(1, 1), padding="SAME",
            dimension_numbers=("NHWC", "HWIO", "NHWC"),
            precision=jax.lax.Precision.HIGHEST)
        return y + b.reshape(1, 1, 1, -1)

    avg = jnp.mean(P2, axis=(1, 2), keepdims=True)           # (B,1,1,C)
    up = jnp.broadcast_to(avg, (B, H, W, C))                  # nearest from 1x1
    x = jnp.concatenate([up, P1], axis=-1)
    y = conv1x1(x, w1, b1)
    y = conv3x3(y, w2, b2)
    y = conv1x1(y, w3, b3)
    y = conv3x3(y, w4, b4)
    y = conv1x1(y, w5, b5)
    F1 = conv3x3(y, w6, b6)
    F2 = jax.lax.reduce_window(F1, -jnp.inf, jax.lax.max,
                               (1, 2, 2, 1), (1, 2, 2, 1), "VALID") + P2
    return F1, F2


# ---------------------------------------------------------------------------
# Main
# ---------------------------------------------------------------------------
if __name__ == "__main__":
    # Small demo shapes (module hardcodes C=256); H=64 exercises top /
    # interior / bottom stripes of the halo logic.
    B, H, W, C = 2, 64, 32, 32
    H2, W2 = H // 2, W // 2
    Cq = C // 4

    key = jax.random.PRNGKey(0)
    keys = jax.random.split(key, 14)
    s = 0.1
    params = (
        jax.random.normal(keys[0], (2 * C, C), jnp.float32) * s,     # conv1 w (1x1)
        jax.random.normal(keys[1], (1, C), jnp.float32) * s,          # conv1 b
        jax.random.normal(keys[2], (3, 3, C, C), jnp.float32) * s,    # conv2 w
        jax.random.normal(keys[3], (1, C), jnp.float32) * s,          # conv2 b
        jax.random.normal(keys[4], (C, Cq), jnp.float32) * s,         # conv3 w (1x1)
        jax.random.normal(keys[5], (1, Cq), jnp.float32) * s,         # conv3 b
        jax.random.normal(keys[6], (3, 3, Cq, Cq), jnp.float32) * s,  # conv4 w
        jax.random.normal(keys[7], (1, Cq), jnp.float32) * s,         # conv4 b
        jax.random.normal(keys[8], (Cq, C), jnp.float32) * s,         # conv5 w (1x1)
        jax.random.normal(keys[9], (1, C), jnp.float32) * s,          # conv5 b
        jax.random.normal(keys[10], (3, 3, C, C), jnp.float32) * s,   # conv6 w
        jax.random.normal(keys[11], (1, C), jnp.float32) * s,         # conv6 b
    )

    P1 = jax.random.normal(keys[12], (B, H, W, C), jnp.float32)
    P2 = jax.random.normal(keys[13], (B, H2, W2, C), jnp.float32)

    F1_ref, F2_ref = reference_forward(P1, P2, params)

    # Default stripe (32 rows) and a smaller stripe that exercises interior
    # stripes whose halos come from real neighbouring data.
    for sr in (None, 16):
        F1, F2 = feature_fusion(P1, P2, params, stripe_rows=sr)
        jax.block_until_ready((F1, F2))
        # Tolerance documents bf16 MXU operands (f32 accumulation) in the
        # kernel vs. Precision.HIGHEST f32 in the reference.
        np.testing.assert_allclose(np.asarray(F1), np.asarray(F1_ref),
                                   rtol=3e-2, atol=3e-2)
        np.testing.assert_allclose(np.asarray(F2), np.asarray(F2_ref),
                                   rtol=3e-2, atol=3e-2)

    # TODO(synk): SELayer is constructed in FeatureFusion.__init__ but never
    # used in forward(), so it is intentionally not implemented.
    print("KERNEL_OK")
</pallas_src>

<mosaic_0001>
module attributes {stable_mosaic.version = 11 : i64} {
  func.func @_avg_pool_kernel(%arg0: i32, %arg1: i32, %arg2: memref<1x8x16x32xf32, #tpu.memory_space<vmem>>, %arg3: memref<1x1x32xf32, #tpu.memory_space<vmem>>, %arg4: memref<1x32xf32, #tpu.memory_space<vmem>>) attributes {dimension_semantics = [#tpu.dimension_semantics<parallel>, #tpu.dimension_semantics<arbitrary>], iteration_bounds = array<i64: 2, 4>, scalar_prefetch = 0 : i64, scratch_operands = 1 : i64, tpu.core_type = #tpu.core_type<tc>, window_params = [{transform_indices = @transform_0, window_bounds = array<i64: 1, 8, 16, 32>}, {transform_indices = @transform_1, window_bounds = array<i64: 1, 1, 32>}]} {
    %c0_i32 = arith.constant 0 : i32
    %0 = arith.cmpi eq, %arg1, %c0_i32 : i32
    %1 = arith.extui %0 : i1 to i32
    %c0_i32_0 = arith.constant 0 : i32
    %2 = arith.cmpi ne, %1, %c0_i32_0 : i32
    scf.if %2 {
      %cst_9 = arith.constant 0.000000e+00 : f32
      %14 = vector.broadcast %cst_9 : f32 to vector<1x32xf32>
      %c0_10 = arith.constant 0 : index
      %c0_11 = arith.constant 0 : index
      %15 = vector.load %arg4[%c0_10, %c0_11] : memref<1x32xf32, #tpu.memory_space<vmem>>, vector<1x32xf32>
      tpu.vector_store %arg4[%c0_10, %c0_11], %14 {strides = array<i32>} : memref<1x32xf32, #tpu.memory_space<vmem>>, vector<1x32xf32>,
    } else {
    }
    %c0 = arith.constant 0 : index
    %c0_1 = arith.constant 0 : index
    %c0_2 = arith.constant 0 : index
    %c0_3 = arith.constant 0 : index
    %3 = vector.load %arg2[%c0, %c0_1, %c0_2, %c0_3] : memref<1x8x16x32xf32, #tpu.memory_space<vmem>>, vector<1x8x16x32xf32>
    %4 = vector.shape_cast %3 : vector<1x8x16x32xf32> to vector<8x16x32xf32>
    %c0_4 = arith.constant 0 : index
    %c0_5 = arith.constant 0 : index
    %5 = vector.load %arg4[%c0_4, %c0_5] : memref<1x32xf32, #tpu.memory_space<vmem>>, vector<1x32xf32>
    %6 = vector.shape_cast %4 : vector<8x16x32xf32> to vector<128x32xf32>
    %cst = arith.constant dense<0.000000e+00> : vector<32xf32>
    %7 = vector.multi_reduction <add>, %6, %cst [0] : vector<128x32xf32> to vector<32xf32>
    %8 = vector.shape_cast %7 : vector<32xf32> to vector<1x32xf32>
    %9 = arith.addf %5, %8 : vector<1x32xf32>
    %c0_6 = arith.constant 0 : index
    %c0_7 = arith.constant 0 : index
    %10 = vector.load %arg4[%c0_6, %c0_7] : memref<1x32xf32, #tpu.memory_space<vmem>>, vector<1x32xf32>
    tpu.vector_store %arg4[%c0_6, %c0_7], %9 {strides = array<i32>} : memref<1x32xf32, #tpu.memory_space<vmem>>, vector<1x32xf32>,
    %c3_i32 = arith.constant 3 : i32
    %11 = arith.cmpi eq, %arg1, %c3_i32 : i32
    %12 = arith.extui %11 : i1 to i32
    %c0_i32_8 = arith.constant 0 : i32
    %13 = arith.cmpi ne, %12, %c0_i32_8 : i32
    scf.if %13 {
      %c0_9 = arith.constant 0 : index
      %c0_10 = arith.constant 0 : index
      %14 = vector.load %arg4[%c0_9, %c0_10] : memref<1x32xf32, #tpu.memory_space<vmem>>, vector<1x32xf32>
      %cst_11 = arith.constant 0.001953125 : f32
      %15 = vector.broadcast %cst_11 : f32 to vector<1x32xf32>
      %16 = arith.mulf %14, %15 : vector<1x32xf32>
      %c0_12 = arith.constant 0 : index
      %c0_13 = arith.constant 0 : index
      %c0_14 = arith.constant 0 : index
      %17 = vector.load %arg3[%c0_12, %c0_13, %c0_14] : memref<1x1x32xf32, #tpu.memory_space<vmem>>, vector<1x1x32xf32>
      %18 = vector.shape_cast %17 : vector<1x1x32xf32> to vector<1x32xf32>
      %19 = vector.shape_cast %16 : vector<1x32xf32> to vector<1x1x32xf32>
      tpu.vector_store %arg3[%c0_12, %c0_13, %c0_14], %19 {strides = array<i32>} : memref<1x1x32xf32, #tpu.memory_space<vmem>>, vector<1x1x32xf32>,
    } else {
    }
    return
  }
  func.func @transform_0(%arg0: i32, %arg1: i32) -> (i32, i32, i32, i32) {
    %c0_i32 = arith.constant 0 : i32
    %c0_i32_0 = arith.constant 0 : i32
    %c0_i32_1 = arith.constant 0 : i32
    return %arg0, %arg1, %c0_i32, %c0_i32_0 : i32, i32, i32, i32
  }
  func.func @transform_1(%arg0: i32, %arg1: i32) -> (i32, i32, i32) {
    %c0_i32 = arith.constant 0 : i32
    %c0_i32_0 = arith.constant 0 : i32
    %c0_i32_1 = arith.constant 0 : i32
    return %arg0, %c0_i32, %c0_i32_0 : i32, i32, i32
  }
}

</mosaic_0001>

<bundles_post_ra>
// kernel: tpu_custom_call.1
= control target key start
LH: loop header
LB: loop body
LE: loop exit
PB: predicated region body
PF: predicated region fallthrough
CT: control target
= control target key end

     0   :  { %6 = vsyncpa [#allocation4], 0  ;;  %s862_s0 = inlined_call_operand.hbm [shape: f32[2,32,16,32], index: 0, kind: input, shape index: {}]   ;;  %s863_s1 = inlined_call_operand.hbm [shape: f32[2,1,32], index: 1, kind: output, shape index: {}]  }
   0x1   :  { %8 = vsyncpa [#allocation4 + $0x1], 0 }
   0x2   :  { %9 = vsyncpa [#allocation5], 0 }
   0x3   :  { %11 = vsyncpa [#allocation5 + $0x1], 0  ;;  %s607_s6 = smov 0   ;;  %s609_s7 = smov 0  }
   0x4   :  { %s611_s8 = smov 0   ;;  %s613_s9 = smov 0  }
   0x5   :  { %s615_s10 = smov 0   ;;  %s617_s11 = smov 0  }
   0x6   :  { %s619_s12 = smov 0   ;;  %s621_s13 = smov 0  }
   0x7   :  { %s623_s14 = smov 0   ;;  %s625_s15 = smov 0  }
   0x8   :  { %s627_s16 = smov 0  }
   0x9 LB: > { %s316_s17 = sadd.s32 4294967295, %s590_s16   ;;  %s317_s18 = sadd.s32 4294967294, %s590_s16   ;;  %s590_s16 = sphi %s627_s16, %s17_s16   ;;  %s586_s15 = sphi %s625_s15, %s884_s15   ;;  %s582_s14 = sphi %s623_s14, %s883_s14   ;;  %s578_s13 = sphi %s621_s13, %s882_s13   ;;  %s574_s12 = sphi %s619_s12, %s881_s12   ;;  %s570_s11 = sphi %s617_s11, %s880_s11   ;;  %s566_s10 = sphi %s615_s10, %s879_s10   ;;  %s562_s9 = sphi %s613_s9, %s878_s9   ;;  %s558_s8 = sphi %s611_s8, %s877_s8   ;;  %s554_s7 = sphi %s609_s7, %s876_s7   ;;  %s550_s6 = sphi %s607_s6, %s875_s6  }
   0xa   : > { %s26_s19 = sadd.s32 1, %s582_s14  ;;  %s29_s20 = sadd.s32 1, %s586_s15 }
   0xb   : > { %p27_p0 = scmp.ge.s32.totalorder %s26_s19, 4  ;;  %s38_s21 = sadd.s32 1, %s570_s11 }
   0xc   : > { %p45_p1 = scmp.ne.s32.totalorder %s570_s11, %s566_s10  ;;  %p46_p2 = scmp.eq.s32.totalorder %s590_s16, 0 }
   0xd   : > { %s886_s19 = smov (%p27_p0, %s26_s19), 0  ;;  %s888_s20 = smov (!%p27_p0, %s29_s20), %s586_s15 }
   0xe   : > { %s34_s22 = ssub.s32 %s582_s14, %s886_s19  ;;  %p673_p3 = por %p46_p2, %p45_p1 }
   0xf   : > { %p31_p4 = scmp.ge.s32.totalorder %s888_s20, 2  ;;  %p51_p5 = scmp.ne.s32.totalorder %s566_s10, %s562_s9 }
  0x10   : > { %p52_p6 = scmp.eq.s32.totalorder %s316_s17, 0  ;;  %s64_s24 = sadd.s32 1, %s558_s8 }
  0x11   : > { %s890_s20 = smov (%p31_p4, %s888_s20), 0  ;;  %p74_p8 = scmp.ne.s32.totalorder %s558_s8, %s554_s7 }
  0x12   : > { %867 = sst [smem:[#allocation9_spill]] %s890_s20  ;;  %p681_p7 = por %p52_p6, %p51_p5 }
  0x13   : > { %s33_s26 = ssub.s32 %s586_s15, %s890_s20  ;;  %p75_p9 = scmp.eq.s32.totalorder %s316_s17, 7 }
  0x14   : > { %s35_s27 = sor.u32 %s34_s22, %s33_s26  ;;  %p62_p10 = scmp.eq.s32.totalorder %s33_s26, 0 }
  0x15   : > { %p36_p11 = scmp.eq.s32.totalorder %s35_s27, 0  ;;  %p689_p12 = por %p75_p9, %p74_p8 }
  0x16   : > { %s694_s29 = scalar_select %p62_p10, %s558_s8, %s64_s24  }
  0x17   : > { %s869_s28 = scalar_select %p689_p12, 1, 0 }
  0x18   : > { %s697_s30 = scalar_select %p36_p11, %s570_s11, %s38_s21  }
  0x19   : > { %p80_p13 = scmp.ne.s32.totalorder %s554_s7, %s550_s6  ;;  %p81_p0 = scmp.eq.s32.totalorder %s317_s18, 7 }
  0x1a   : > { %p345_p1 = scmp.lt.s32.totalorder %s590_s16, 8  ;;  %s101_s3 = sand.u32 1, %s570_s11  }
  0x1b   : > { %p702_p2 = por %p81_p0, %p80_p13  ;;  %s320_s4 = sshll.u32 %s101_s3, 7 }
  0x1c   : > { %s332_s5 = sshll.u32 %s582_s14, 4  ;;  %s323_s9 = sshll.u32 %s586_s15, 6 }
  0x1d   : > { %s870_s2 = scalar_select %p702_p2, 1, 0 }
  0x1e   : > { %s105_s17 = scalar_lea.vmem [#allocation3], %s320_s4  ;;  %s112_s26 = sadd.s32 %s332_s5, %s323_s9 }
  0x1f   : > { %s115_s22 = sshll.u32 %s105_s17, 4  ;;  %s324_s24 = sshll.u32 %s112_s26, 7  ;;  %s709_s22 = int_to_ptr.vmem [resolvable:$true] %s115_s22 }
  0x20   : > { %p713_p4 = pnand %p345_p1, %p673_p3  ;;  %s720_s20 = scalar_lea.hbm %s862_s0, %s324_s24 }
  0x21   : > { %s722_s4 = scalar_lea.sflag [#allocation4], %s101_s3  ;;  %s438_s5 = scalar_lea.hbm %s720_s20, 2048 }
  0x22   : > { %p439_p5 = scmp.ne.s32.totalorder %s720_s20, %s438_s5  ;;  %p440_p3 = pneg %p713_p4 }
  0x23   : > { %s443_s17 = scalar_lea.hbm %s862_s0, 16384  ;;  %p444_p9 = scmp.lt.u32.totalorder %s720_s20, %s862_s0 }
  0x24   : > { %p441_p6 = pnand %p440_p3, %p439_p5  ;;  %p445_p10 = scmp.lt.u32.totalorder %s443_s17, %s438_s5 }
  0x25   : > { %p447_p13 = scmp.lt.u32.totalorder %s438_s5, %s720_s20 }
  0x26   : > { %p442_p8 = pneg %p441_p6  ;;  %p446_p11 = por %p445_p10, %p444_p9 }
  0x28   : > { %p448_p0 = por %p447_p13, %p446_p11 }
  0x2a   : > { %p449_p1 = pnand %p448_p0, %p442_p8 }
  0x2c   : > { %452 = shalt.err (!%p449_p1)
}
  0x2d   : > { %s453_s3 = scalar_lea.vmem %s709_s22, 2048  ;;  %s592_s18 = smov [#allocation3]  }
  0x2e   : > { %p454_p5 = scmp.ne.s32.totalorder %s709_s22, %s453_s3  ;;  %s458_s27 = sshll.u32 %s592_s18, 4  ;;  %s459_s27 = int_to_ptr.vmem [resolvable:$false] %s458_s27 }
  0x2f   : > { %s460_s23 = scalar_lea.vmem %s459_s27, 4096  ;;  %p461_p12 = scmp.lt.s32.totalorder %s709_s22, %s459_s27 }
  0x30   : > { %p456_p6 = pnand %p454_p5, %p440_p3  ;;  %p462_p9 = scmp.lt.s32.totalorder %s460_s23, %s453_s3 }
  0x32   : > { %p457_p2 = pneg %p456_p6  ;;  %p463_p10 = por %p462_p9, %p461_p12 }
  0x34   : > { %p464_p11 = pnand %p463_p10, %p457_p2 }
  0x36   : > { %467 = shalt.err (!%p464_p11)
}
  0x37   : > { %s593_s5 = smov 128   ;;  %s594_s9 = smov 8  }
  0x38   : > { %340 = dma.hbm_to_vmem [thread:$0]  (!%p713_p4), %s720_s20, 2048, %s709_s22, %s722_s4, %s593_s5, %s593_s5, %s594_s9  }
  0x39   : > { %p325_p3 = scmp.ge.s32.totalorder %s590_s16, 1  ;;  %p123_p8 = scmp.lt.s32.totalorder %s590_s16, 9 }
  0x3b   : > { %p124_p13 = pnand %p325_p3, %p123_p8 }
  0x3c   : > { %s129_s17 = sand.u32 (!%p124_p13), 1, %s566_s10  }
  0x3d   : > { %127 = sbr.rel (%p124_p13) target bundleno = 160 (0xa0), region = 24  ;;  %s326_s26 = sshll.u32 (!%p124_p13), %s129_s17, 7 }
  0x3e   : > { %s130_s24 = scalar_lea.sflag (!%p124_p13), [#allocation4], %s129_s17  ;;  %s753_s3 = scalar_lea.vmem (!%p124_p13), [#allocation3], %s326_s26 }
  0x44   : > { %541 = dma.done.wait (%p681_p7), %s130_s24, 2048  }
  0x45   : > { %543 = vsyncadd (%p681_p7), %s130_s24, 4294965248  ;;  %s149_s21 = sand.u32 1, %s554_s7   ;;  %p327_p12 = scmp.ne.s32.totalorder %s574_s12, 0 }
  0x46   : > { %s762_s20 = scalar_lea.vmem [#allocation6], %s149_s21  ;;  %vm156_vm0 = vcmask (!%p327_p12), 253952   ;;  %v595_v0 = vmov (!%p327_p12), 0.0  }
  0x47   : > { %155 = sbr.rel (%p327_p12) target bundleno = 78 (0x4e), region = 32  ;;  %157 = vst.msk [vmem:[#allocation2] sm:$0x1] (!%p327_p12), %vm156_vm0, %v595_v0 }
  0x4e PF: > { %v158_v1 = vld [vmem:[%s753_s3] sm:$0xff]  ;;  %v159_v2 = vld [vmem:[%s753_s3 + $0x8] sm:$0xff]  ;;  %v160_v3 = vld [vmem:[%s753_s3 + $0x10] sm:$0xff]  ;;  %vm175_vm1 = vcmask 261120   ;;  %vm214_vm2 = vcmask 253952   ;;  %p328_p7 = scmp.ne.s32.totalorder %s574_s12, 3 }
  0x4f   : > { %v161_v4 = vld [vmem:[%s753_s3 + $0x18] sm:$0xff]  ;;  %v176_v5 = vsel %vm175_vm1, %v158_v1, 0.0  ;;  %v177_v6 = vsel %vm175_vm1, %v159_v2, 0.0  ;;  %v179_v7 = vsel %vm175_vm1, %v160_v3, 0.0  ;;  %v162_v8 = vld [vmem:[%s753_s3 + $0x20] sm:$0xff]  ;;  %v163_v11 = vld [vmem:[%s753_s3 + $0x28] sm:$0xff] }
  0x50   : > { %v178_v9 = vadd.f32 %v177_v6, %v176_v5  ;;  %v181_v10 = vsel %vm175_vm1, %v161_v4, 0.0  ;;  %v183_v13 = vsel %vm175_vm1, %v162_v8, 0.0  ;;  %v164_v14 = vld [vmem:[%s753_s3 + $0x30] sm:$0xff]  ;;  %v185_v16 = vsel %vm175_vm1, %v163_v11, 0.0  ;;  %v165_v17 = vld [vmem:[%s753_s3 + $0x38] sm:$0xff]  ;;  %v166_v20 = vld [vmem:[%s753_s3 + $0x40] sm:$0xff] }
  0x51   : > { %v187_v19 = vsel %vm175_vm1, %v164_v14, 0.0  ;;  %v189_v22 = vsel %vm175_vm1, %v165_v17, 0.0  ;;  %v167_v23 = vld [vmem:[%s753_s3 + $0x48] sm:$0xff]  ;;  %v191_v25 = vsel %vm175_vm1, %v166_v20, 0.0  ;;  %v168_v26 = vld [vmem:[%s753_s3 + $0x50] sm:$0xff]  ;;  %v169_v29 = vld [vmem:[%s753_s3 + $0x58] sm:$0xff] }
  0x52   : > { %v180_v12 = vadd.f32 %v179_v7, %v178_v9  ;;  %v193_v28 = vsel %vm175_vm1, %v167_v23, 0.0  ;;  %v195_v31 = vsel %vm175_vm1, %v168_v26, 0.0  ;;  %v170_v32 = vld [vmem:[%s753_s3 + $0x60] sm:$0xff]  ;;  %v197_v34 = vsel %vm175_vm1, %v169_v29, 0.0  ;;  %v171_v35 = vld [vmem:[%s753_s3 + $0x68] sm:$0xff]  ;;  %v172_v38 = vld [vmem:[%s753_s3 + $0x70] sm:$0xff] }
  0x53   : > { %v199_v37 = vsel %vm175_vm1, %v170_v32, 0.0  ;;  %v201_v40 = vsel %vm175_vm1, %v171_v35, 0.0  ;;  %v173_v41 = vld [vmem:[%s753_s3 + $0x78] sm:$0xff]  ;;  %v203_v43 = vsel %vm175_vm1, %v172_v38, 0.0 }
  0x54   : > { %v182_v15 = vadd.f32 %v181_v10, %v180_v12  ;;  %v205_v45 = vsel %vm175_vm1, %v173_v41, 0.0  ;;  %v174_v53 = vld [vmem:[#allocation2] sm:$0x1] }
  0x56   : > { %v184_v18 = vadd.f32 %v183_v13, %v182_v15 }
  0x58   : > { %v186_v21 = vadd.f32 %v185_v16, %v184_v18 }
  0x5a   : > { %v188_v24 = vadd.f32 %v187_v19, %v186_v21 }
  0x5c   : > { %v190_v27 = vadd.f32 %v189_v22, %v188_v24 }
  0x5e   : > { %v192_v30 = vadd.f32 %v191_v25, %v190_v27 }
  0x60   : > { %v194_v33 = vadd.f32 %v193_v28, %v192_v30 }
  0x62   : > { %v196_v36 = vadd.f32 %v195_v31, %v194_v33 }
  0x64   : > { %v198_v39 = vadd.f32 %v197_v34, %v196_v36 }
  0x66   : > { %v200_v42 = vadd.f32 %v199_v37, %v198_v39 }
  0x68   : > { %v202_v44 = vadd.f32 %v201_v40, %v200_v42 }
  0x6a   : > { %v204_v46 = vadd.f32 %v203_v43, %v202_v44 }
  0x6c   : > { %v206_v47 = vadd.f32 %v205_v45, %v204_v46 }
  0x6e   : > { %v207_v48 = vrot.slane %v206_v47, 4 }
  0x70   : > { %v208_v49 = vadd.f32 %v207_v48, %v206_v47 }
  0x72   : > { %v209_v50 = vrot.slane %v208_v49, 2 }
  0x74   : > { %v210_v51 = vadd.f32 %v209_v50, %v208_v49 }
  0x76   : > { %v211_v52 = vrot.slane %v210_v51, 1  ;;  %219 = sbr.rel (%p328_p7) target bundleno = 135 (0x87), region = 36 }
  0x78   : > { %v212_v54 = vadd.f32 %v211_v52, %v210_v51 }
  0x7a   : > { %v213_v55 = vadd.f32 %v212_v54, %v174_v53 }
  0x7c   : > { %215 = vst.msk [vmem:[#allocation2] sm:$0x1] %vm214_vm2, %v213_v55 }
  0x83   : > { %v220_v56 = vld [vmem:[#allocation2] sm:$0x1] }
  0x84   : > { %v221_v57 = vmul.f32 0.001953125, %v220_v56 }
  0x86   : > { %222 = vst.msk [vmem:[%s762_s20] sm:$0x1] %vm214_vm2, %v221_v57 }
  0x87 PF: > { %s329_s25 = sshll.u32 %s578_s13, 4  ;;  %s236_s27 = sshll.u32 %s762_s20, 4  ;;  %s237_s27 = int_to_ptr.vmem [resolvable:$true] %s236_s27 }
  0x88   : > { %s803_s18 = scalar_lea.hbm %s863_s1, %s329_s25  ;;  %s224_s12 = scalar_lea.sflag [#allocation5], %s149_s21 }
  0x89   : > { %s468_s23 = scalar_lea.vmem %s237_s27, 16  ;;  %p872_p4 = scmp.ne.s32.totalorder %s869_s28, 0 }
  0x8a   : > { %p469_p2 = scmp.ne.s32.totalorder %s237_s27, %s468_s23  ;;  %s596_s5 = smov [#allocation6]  }
  0x8b   : > { %s472_s9 = sshll.u32 %s596_s5, 4  ;;  %s473_s9 = int_to_ptr.vmem [resolvable:$false] %s472_s9 }
  0x8c   : > { %p470_p0 = pnand %p469_p2, %p872_p4  ;;  %s474_s17 = scalar_lea.vmem %s473_s9, 32 }
  0x8d   : > { %p475_p5 = scmp.lt.s32.totalorder %s237_s27, %s473_s9  ;;  %p476_p6 = scmp.lt.s32.totalorder %s474_s17, %s468_s23 }
  0x8e   : > { %p471_p1 = pneg %p470_p0 }
  0x8f   : > { %p477_p9 = por %p476_p6, %p475_p5 }
  0x91   : > { %p478_p10 = pnand %p477_p9, %p471_p1 }
  0x93   : > { %481 = shalt.err (!%p478_p10)
}
  0x94   : > { %s482_s13 = scalar_lea.hbm %s803_s18, 16  ;;  %s486_s3 = scalar_lea.hbm %s863_s1, 32 }
  0x95   : > { %p483_p11 = scmp.ne.s32.totalorder %s803_s18, %s482_s13  ;;  %p487_p13 = scmp.lt.u32.totalorder %s803_s18, %s863_s1 }
  0x96   : > { %p488_p12 = scmp.lt.u32.totalorder %s486_s3, %s482_s13  ;;  %p490_p2 = scmp.lt.u32.totalorder %s482_s13, %s803_s18 }
  0x97   : > { %p484_p3 = pnand %p483_p11, %p872_p4 }
  0x98   : > { %p489_p7 = por %p488_p12, %p487_p13 }
  0x99   : > { %p485_p8 = pneg %p484_p3 }
  0x9a   : > { %p491_p0 = por %p490_p2, %p489_p7 }
  0x9c   : > { %p492_p1 = pnand %p491_p0, %p485_p8 }
  0x9e   : > { %495 = shalt.err (!%p492_p1)
}
  0x9f   : > { %335 = dma.vmem_to_hbm [thread:$0]  (%p872_p4), %s237_s27, 16, %s803_s18, %s224_s12  }
  0xa0 PF: > { %p346_p5 = scmp.ge.s32.totalorder %s590_s16, 2  ;;  %s248_s25 = sand.u32 1, %s550_s6  }
  0xa1   : > { %p873_p6 = scmp.ne.s32.totalorder %s870_s2, 0  ;;  %s249_s22 = scalar_lea.sflag [#allocation5], %s248_s25 }
  0xa3   : > { %p342_p9 = pnand %p346_p5, %p873_p6 }
  0xa5   : > { %545 = dma.done.wait (!%p342_p9), %s249_s22, 16  }
  0xa6   : > { %547 = vsyncadd (!%p342_p9), %s249_s22, 4294967280  ;;  %s17_s16 = sadd.s32 1, %s590_s16   ;;  %s874_s28 = sld [smem:[#allocation9_spill]] }
  0xa7   : > { %p14_p10 = scmp.ge.s32.totalorder %s17_s16, 10   ;;  %s875_s6 = smov %s554_s7 }
  0xa8   : > { %s876_s7 = smov %s558_s8  ;;  %s877_s8 = smov %s694_s29 }
  0xa9   : > { %s878_s9 = smov %s566_s10  ;;  %s879_s10 = smov %s570_s11 }
  0xaa   : > { %s880_s11 = smov %s697_s30  ;;  %s881_s12 = smov %s582_s14 }
  0xab   : > { %s882_s13 = smov %s586_s15  ;;  %s883_s14 = smov %s886_s19 }
  0xac   : > { %s884_s15 = smov %s874_s28  ;;  %16 = sbr.rel (!%p14_p10) target bundleno = 9 (0x9), region = 77 }
  0xb3   :  { %253 = vsyncpa [#allocation4], 1 }
  0xb4   :  { %255 = vsyncpa [#allocation4 + $0x1], 1 }
  0xb5   :  { %256 = vsyncpa [#allocation5], 1 }
  0xb6   :  { %258 = vsyncpa [#allocation5 + $0x1], 1 }

</bundles_post_ra>
